<compile_context>
chip_gen: v5e
topology: v5e:2x2
jax: 0.10.0
libtpu: 0.0.40
codegen_flags: <defaults>
</compile_context>

<pallas_src>
import functools

import jax
import jax.numpy as jnp
from jax import lax
from jax.experimental import pallas as pl
from jax.experimental.pallas import tpu as pltpu

_LANE = 128
_VMEM_LIMIT = 32 * 1024 * 1024  # safe on v5e/v6e (128 MiB) and v7x (64 MiB physical)


def _round_up(n, m):
    return ((n + m - 1) // m) * m


def _pick_channel_block(cout):
    """Largest multiple-of-8 channel block that still yields >=2 blocks (megacore)."""
    for cblk in (128, 64, 32, 16, 8):
        if cout % cblk == 0 and cout // cblk >= 2:
            return cblk
    return cout


def _conv_accumulate(x_ref, xh_ref, w, out_width):
    """Valid stride-1 conv1d as K*C_in VPU broadcast multiply-adds (lane-dense).

    x_ref:  (N, C_in, >= out_width + K - 1) VMEM ref (current tile / full input)
    xh_ref: optional (N, C_in, 128) VMEM ref: halo columns appended after x_ref
    w:      (K, C_in, C_blk, 1) f32 values (already hoisted out of the ref)
    returns (N, C_blk, out_width) f32 accumulator.
    """
    N, Cin, _ = x_ref.shape
    K, _, Cb, _ = w.shape
    acc = jnp.zeros((N, Cb, out_width), jnp.float32)
    for ci in range(Cin):
        xc = x_ref[:, ci:ci + 1, :]
        if xh_ref is not None:
            # 128-aligned lane concat: brings in the K-1 halo columns of the next tile.
            xc = jnp.concatenate([xc, xh_ref[:, ci:ci + 1, :]], axis=-1)
        xc = xc.astype(jnp.float32)                       # (N, 1, >= out_width + K - 1)
        for k in range(K):
            # NOTE: a stride-0 pl.ds sublane-broadcast load of C_blk copies would move
            # this sublane broadcast onto the vld slot; kept value-level for lowering
            # robustness at the tiny channel counts this block uses.
            acc = acc + xc[:, :, k:k + out_width] * w[k, ci].reshape(1, Cb, 1)
    return acc


# ----------------------------- resident fast path -----------------------------


def _fused_resident_kernel(x_ref, w_ref, g_ref, b_ref, o_ref, *, eps, lout):
    """Single-step fused conv + BN(batch stats) + ReLU; whole (padded) input resident.

    x_ref: (N, C_in, L_pad)        VMEM (unblocked, single-buffered)
    w_ref: (K, C_in, C_blk, 1)     VMEM
    g_ref, b_ref: (C_blk, 1)       VMEM
    o_ref: (N, C_blk, Lout_pad)    VMEM (lane-dense, pad sliced off in the wrapper)
    """
    N = x_ref.shape[0]
    Cb = w_ref.shape[2]
    lout_pad = o_ref.shape[2]

    w = w_ref[...].astype(jnp.float32)                    # one hoisted weight load
    acc = _conv_accumulate(x_ref, None, w, lout_pad)      # (N, Cb, lout_pad) f32
    # Conv bias intentionally omitted: a per-channel constant is exactly cancelled by
    # the train-mode BatchNorm mean subtraction below.

    # Per-channel batch statistics over the *valid* (N, lout) region only.
    lane = lax.broadcasted_iota(jnp.int32, (1, 1, lout_pad), 2)
    valid = lane < lout
    count = float(N * lout)
    accm = jnp.where(valid, acc, 0.0)
    mean = jnp.sum(accm, axis=(0, 2), keepdims=True) / count          # (1, Cb, 1)
    # Two-pass (centered) variance: cheap here and avoids E[x^2]-E[x]^2 cancellation.
    diff = jnp.where(valid, acc - mean, 0.0)
    var = jnp.sum(diff * diff, axis=(0, 2), keepdims=True) / count
    inv_std = lax.rsqrt(var + eps)

    gamma = g_ref[...].astype(jnp.float32).reshape(1, Cb, 1)
    beta = b_ref[...].astype(jnp.float32).reshape(1, Cb, 1)
    a_aff = gamma * inv_std
    b_aff = beta - mean * a_aff

    # Fused affine + ReLU, written to a lane-dense (multiple-of-128) output block.
    o_ref[...] = jnp.maximum(acc * a_aff + b_aff, 0.0).astype(o_ref.dtype)


def _forward_resident(x, w_r, gamma, beta, eps, lout, lout_pad, cblk):
    N, Cin, L = x.shape
    K, _, Cout, _ = w_r.shape
    l_pad = lout_pad + K - 1
    x_pad = jnp.pad(x, ((0, 0), (0, 0), (0, l_pad - L)))
    g_r = gamma.reshape(Cout, 1)
    b_r = beta.reshape(Cout, 1)

    kernel = functools.partial(_fused_resident_kernel, eps=eps, lout=lout)
    out_pad = pl.pallas_call(
        kernel,
        out_shape=jax.ShapeDtypeStruct((N, Cout, lout_pad), x.dtype),
        grid=(Cout // cblk,),
        in_specs=[
            # Whole padded input resident in VMEM, single-buffered (its index never
            # changes across the channel grid, so pipelining would only double it).
            pl.BlockSpec(memory_space=pltpu.MemorySpace.VMEM),
            pl.BlockSpec((K, Cin, cblk, 1), lambda c: (0, 0, c, 0)),
            pl.BlockSpec((cblk, 1), lambda c: (c, 0)),
            pl.BlockSpec((cblk, 1), lambda c: (c, 0)),
        ],
        out_specs=pl.BlockSpec((N, cblk, lout_pad), lambda c: (0, c, 0)),
        compiler_params=pltpu.CompilerParams(
            dimension_semantics=("parallel",),    # channel blocks shard across TCs
            vmem_limit_bytes=_VMEM_LIMIT,
        ),
    )(x_pad, w_r, g_r, b_r)
    return out_pad[:, :, :lout]


# ------------------------------ L-tiled two-pass path ------------------------------


def _tile_stats_kernel(x_ref, xh_ref, w_ref, s_ref, *, lout):
    """Pass 1: accumulate per-channel sum / sum-of-squares of the conv output.

    x_ref:  (N, C_in, T) current L tile; xh_ref: (N, C_in, 128) halo (next columns)
    w_ref:  (K, C_in, C_out, 1)
    s_ref:  (C_out, 2) accumulator output (constant block index across the grid)
    """
    l = pl.program_id(0)
    T = x_ref.shape[2]
    Cout = w_ref.shape[2]

    @pl.when(l == 0)
    def _init():
        s_ref[...] = jnp.zeros_like(s_ref)

    w = w_ref[...].astype(jnp.float32)
    acc = _conv_accumulate(x_ref, xh_ref, w, T)            # (N, Cout, T) f32

    lane = lax.broadcasted_iota(jnp.int32, (1, 1, T), 2)
    accm = jnp.where(l * T + lane < lout, acc, 0.0)        # mask padded columns
    s1 = jnp.sum(accm, axis=(0, 2), keepdims=True).reshape(Cout, 1)
    s2 = jnp.sum(accm * accm, axis=(0, 2), keepdims=True).reshape(Cout, 1)
    s_ref[:, 0:1] += s1
    s_ref[:, 1:2] += s2


def _tile_apply_kernel(x_ref, xh_ref, w_ref, a_ref, b_ref, o_ref):
    """Pass 2: recompute the cheap conv for this tile, apply folded BN affine + ReLU."""
    T = o_ref.shape[2]
    Cb = w_ref.shape[2]
    w = w_ref[...].astype(jnp.float32)
    acc = _conv_accumulate(x_ref, xh_ref, w, T)            # (N, Cb, T) f32
    a_aff = a_ref[...].astype(jnp.float32).reshape(1, Cb, 1)
    b_aff = b_ref[...].astype(jnp.float32).reshape(1, Cb, 1)
    o_ref[...] = jnp.maximum(acc * a_aff + b_aff, 0.0).astype(o_ref.dtype)


def _pick_l_tile(N, Cin, cblk, itemsize, budget=8 * 1024 * 1024):
    for t in (1024, 512, 256, 128):
        per_step = (2 * N * Cin * (t + _LANE) * itemsize   # x tile + halo (double-buffered)
                    + 2 * N * cblk * t * itemsize          # output blocks
                    + 2 * N * cblk * t * 4)                # f32 accumulator + headroom
        if per_step <= budget:
            return t
    # TODO(synk): also tile the batch axis if N alone blows the per-step budget.
    return _LANE


def _forward_tiled(x, w_r, gamma, beta, eps, lout, cblk, l_tile):
    N, Cin, L = x.shape
    K, _, Cout, _ = w_r.shape
    itemsize = jnp.dtype(x.dtype).itemsize
    if l_tile is None:
        T = _pick_l_tile(N, Cin, cblk, itemsize)
    else:
        T = max(_round_up(l_tile, _LANE), _LANE)
    n_tiles = int(pl.cdiv(lout, T))
    l_total = n_tiles * T
    # Pad so that every tile has a full 128-wide halo block to its right (the halo
    # carries the K-1 extra input columns the valid-conv needs at each tile boundary).
    x_pad = jnp.pad(x, ((0, 0), (0, 0), (0, l_total + _LANE - L)))
    halo_idx = T // _LANE                                  # halo blocks are 128 wide

    # ---- pass 1: per-channel sum / sum-of-squares of the conv output ----
    stats = pl.pallas_call(
        functools.partial(_tile_stats_kernel, lout=lout),
        out_shape=jax.ShapeDtypeStruct((Cout, 2), jnp.float32),
        grid=(n_tiles,),
        in_specs=[
            pl.BlockSpec((N, Cin, T), lambda l: (0, 0, l)),
            pl.BlockSpec((N, Cin, _LANE), lambda l: (0, 0, (l + 1) * halo_idx)),
            pl.BlockSpec((K, Cin, Cout, 1), lambda l: (0, 0, 0, 0)),
        ],
        out_specs=pl.BlockSpec((Cout, 2), lambda l: (0, 0)),
        compiler_params=pltpu.CompilerParams(
            dimension_semantics=("arbitrary",),   # stats accumulate across L tiles
            vmem_limit_bytes=_VMEM_LIMIT,
        ),
    )(x_pad, x_pad, w_r)

    # Fold BN into one per-channel affine (tiny (C_out,)-sized XLA ops).
    count = float(N * lout)
    mean = stats[:, 0] / count
    # NOTE: E[x^2]-E[x]^2 can lose precision when |mean| >> std at very large N*L_out;
    # fine in f32 with eps=1e-3 at the scales this block targets.
    var = jnp.maximum(stats[:, 1] / count - mean * mean, 0.0)
    a_aff = gamma.astype(jnp.float32) * lax.rsqrt(var + eps)
    b_aff = beta.astype(jnp.float32) - mean * a_aff
    a_r = a_aff.reshape(Cout, 1)
    b_r = b_aff.reshape(Cout, 1)

    # ---- pass 2: recompute conv per tile, apply affine + ReLU (fully parallel) ----
    out_pad = pl.pallas_call(
        _tile_apply_kernel,
        out_shape=jax.ShapeDtypeStruct((N, Cout, l_total), x.dtype),
        grid=(Cout // cblk, n_tiles),
        in_specs=[
            pl.BlockSpec((N, Cin, T), lambda c, l: (0, 0, l)),
            pl.BlockSpec((N, Cin, _LANE), lambda c, l: (0, 0, (l + 1) * halo_idx)),
            pl.BlockSpec((K, Cin, cblk, 1), lambda c, l: (0, 0, c, 0)),
            pl.BlockSpec((cblk, 1), lambda c, l: (c, 0)),
            pl.BlockSpec((cblk, 1), lambda c, l: (c, 0)),
        ],
        out_specs=pl.BlockSpec((N, cblk, T), lambda c, l: (0, c, l)),
        compiler_params=pltpu.CompilerParams(
            dimension_semantics=("parallel", "parallel"),   # megacore shards this pass
            vmem_limit_bytes=_VMEM_LIMIT,
        ),
    )(x_pad, x_pad, w_r, a_r, b_r)
    return out_pad[:, :, :lout]


# ------------------------------------- wrapper -------------------------------------


def conv1d_bn_relu(x, weight, bias=None, gamma=None, beta=None, eps=1e-3, *,
                   l_tile=None, resident_vmem_budget=12 * 1024 * 1024,
                   force_tiled=False):
    """PyTorch-convention Conv1d -> BatchNorm1d(train batch stats) -> ReLU.

    x:      (N, C_in, L) NCW input (kept NCW; the long L axis stays on lanes).
    weight: (C_out, C_in, K) PyTorch Conv1d weight.
    bias:   (C_out,) accepted for API parity; mathematically cancelled by the
            train-mode BatchNorm mean subtraction, so unused for the forward output.
    gamma, beta: (C_out,) BatchNorm affine parameters.
    Returns (N, C_out, L_out) with L_out = L - K + 1.
    """
    del bias  # cancelled by BN mean subtraction (train-mode forward output unchanged)
    N, Cin, L = x.shape
    Cout, Cin_w, K = weight.shape
    assert Cin_w == Cin and gamma is not None and beta is not None
    lout = L - K + 1
    assert lout >= 1

    # Tiny parameter re-layout only (K*Cin*Cout elements); no activation transposes.
    w_r = jnp.transpose(weight, (2, 1, 0)).reshape(K, Cin, Cout, 1)
    cblk = _pick_channel_block(Cout)

    # ---- size-guarded dispatch: resident single-step path vs. L-tiled two-pass ----
    lout_pad = max(_round_up(lout, _LANE), _LANE)
    l_pad = lout_pad + K - 1
    itemsize = jnp.dtype(x.dtype).itemsize
    resident_bytes = (N * Cin * l_pad * itemsize            # x, single-buffered
                      + 2 * N * cblk * lout_pad * itemsize  # double-buffered out blocks
                      + 2 * N * cblk * lout_pad * 4)        # f32 acc + masked temp
    if not force_tiled and resident_bytes <= resident_vmem_budget:
        return _forward_resident(x, w_r, gamma, beta, eps, lout, lout_pad, cblk)
    return _forward_tiled(x, w_r, gamma, beta, eps, lout, cblk, l_tile)


# ------------------------------------ reference ------------------------------------


def _reference(x_ncw, weight, bias, gamma, beta, eps=1e-3):
    """Pure-JAX reference replicating nn.Conv1d + nn.BatchNorm1d(train) + ReLU."""
    y = lax.conv_general_dilated(
        x_ncw, weight, window_strides=(1,), padding="VALID",
        dimension_numbers=("NCH", "OIH", "NCH"), precision=lax.Precision.HIGHEST,
    )
    y = y + bias.reshape(1, -1, 1)
    mean = jnp.mean(y, axis=(0, 2), keepdims=True)
    var = jnp.mean((y - mean) ** 2, axis=(0, 2), keepdims=True)
    yn = (y - mean) * lax.rsqrt(var + eps)
    yn = yn * gamma.reshape(1, -1, 1) + beta.reshape(1, -1, 1)
    return jnp.maximum(yn, 0.0)


if __name__ == "__main__":
    key = jax.random.PRNGKey(0)
    kx, kw, kb, kg, kbe, kx2 = jax.random.split(key, 6)

    # Shapes consistent with the module: batch=2, in_channels=4, length=16,
    # out_channels=8, filter_size=3  ->  output (2, 8, 14).
    N, Cin, L, Cout, K = 2, 4, 16, 8, 3
    x = jax.random.normal(kx, (N, Cin, L), dtype=jnp.float32)
    bound = 1.0 / (Cin * K) ** 0.5
    weight = jax.random.uniform(kw, (Cout, Cin, K), jnp.float32, -bound, bound)
    bias = jax.random.uniform(kb, (Cout,), jnp.float32, -bound, bound)
    gamma = 1.0 + 0.1 * jax.random.normal(kg, (Cout,), dtype=jnp.float32)
    beta = 0.1 * jax.random.normal(kbe, (Cout,), dtype=jnp.float32)

    # --- resident single-step fast path ---
    out = jax.block_until_ready(conv1d_bn_relu(x, weight, bias, gamma, beta))
    ref = _reference(x, weight, bias, gamma, beta)
    assert out.shape == (N, Cout, L - K + 1), out.shape
    assert jnp.allclose(out, ref, atol=1e-4, rtol=1e-4), float(jnp.max(jnp.abs(out - ref)))

    # --- L-tiled two-pass path, exercised explicitly at a longer trace length ---
    L2 = 700
    x2 = jax.random.normal(kx2, (N, Cin, L2), dtype=jnp.float32)
    out2 = jax.block_until_ready(
        conv1d_bn_relu(x2, weight, bias, gamma, beta, force_tiled=True, l_tile=256))
    ref2 = _reference(x2, weight, bias, gamma, beta)
    assert out2.shape == (N, Cout, L2 - K + 1), out2.shape
    assert jnp.allclose(out2, ref2, atol=3e-4, rtol=3e-4), float(jnp.max(jnp.abs(out2 - ref2)))

    print("KERNEL_OK")
</pallas_src>

<mosaic_0001>
module attributes {stable_mosaic.version = 11 : i64} {
  func.func @_fused_resident_kernel(%arg0: i32, %arg1: memref<2x4x130xf32, #tpu.memory_space<vmem>>, %arg2: memref<3x4x8x1xf32, #tpu.memory_space<vmem>>, %arg3: memref<8x1xf32, #tpu.memory_space<vmem>>, %arg4: memref<8x1xf32, #tpu.memory_space<vmem>>, %arg5: memref<2x8x128xf32, #tpu.memory_space<vmem>>) attributes {dimension_semantics = [#tpu.dimension_semantics<parallel>], iteration_bounds = array<i64: 1>, scalar_prefetch = 0 : i64, scratch_operands = 0 : i64, tpu.core_type = #tpu.core_type<tc>, window_params = [{pipeline_mode = #tpu.pipeline_mode<synchronous>, transform_indices = @transform_0, window_bounds = array<i64: 2, 4, 130>}, {transform_indices = @transform_1, window_bounds = array<i64: 3, 4, 8, 1>}, {transform_indices = @transform_2, window_bounds = array<i64: 8, 1>}, {transform_indices = @transform_3, window_bounds = array<i64: 8, 1>}, {transform_indices = @transform_4, window_bounds = array<i64: 2, 8, 128>}]} {
    %c0 = arith.constant 0 : index
    %c0_0 = arith.constant 0 : index
    %c0_1 = arith.constant 0 : index
    %c0_2 = arith.constant 0 : index
    %0 = vector.load %arg2[%c0, %c0_0, %c0_1, %c0_2] : memref<3x4x8x1xf32, #tpu.memory_space<vmem>>, vector<3x4x8x1xf32>
    %cst = arith.constant 0.000000e+00 : f32
    %1 = vector.broadcast %cst : f32 to vector<2x8x128xf32>
    %c0_3 = arith.constant 0 : index
    %c0_4 = arith.constant 0 : index
    %c0_5 = arith.constant 0 : index
    %2 = vector.load %arg1[%c0_3, %c0_4, %c0_5] : memref<2x4x130xf32, #tpu.memory_space<vmem>>, vector<2x1x130xf32>
    %3 = vector.extract_strided_slice %2 {offsets = [0, 0, 0], sizes = [2, 1, 128], strides = [1, 1, 1]} : vector<2x1x130xf32> to vector<2x1x128xf32>
    %4 = vector.extract_strided_slice %0 {offsets = [0, 0, 0, 0], sizes = [1, 1, 8, 1], strides = [1, 1, 1, 1]} : vector<3x4x8x1xf32> to vector<1x1x8x1xf32>
    %5 = vector.shape_cast %4 : vector<1x1x8x1xf32> to vector<8x1xf32>
    %6 = vector.shape_cast %5 : vector<8x1xf32> to vector<1x8x1xf32>
    %7 = vector.broadcast %3 : vector<2x1x128xf32> to vector<2x8x128xf32>
    %8 = vector.broadcast %6 : vector<1x8x1xf32> to vector<2x8x128xf32>
    %9 = arith.mulf %7, %8 : vector<2x8x128xf32>
    %10 = arith.addf %1, %9 : vector<2x8x128xf32>
    %11 = vector.extract_strided_slice %2 {offsets = [0, 0, 1], sizes = [2, 1, 128], strides = [1, 1, 1]} : vector<2x1x130xf32> to vector<2x1x128xf32>
    %12 = vector.extract_strided_slice %0 {offsets = [1, 0, 0, 0], sizes = [1, 1, 8, 1], strides = [1, 1, 1, 1]} : vector<3x4x8x1xf32> to vector<1x1x8x1xf32>
    %13 = vector.shape_cast %12 : vector<1x1x8x1xf32> to vector<8x1xf32>
    %14 = vector.shape_cast %13 : vector<8x1xf32> to vector<1x8x1xf32>
    %15 = vector.broadcast %11 : vector<2x1x128xf32> to vector<2x8x128xf32>
    %16 = vector.broadcast %14 : vector<1x8x1xf32> to vector<2x8x128xf32>
    %17 = arith.mulf %15, %16 : vector<2x8x128xf32>
    %18 = arith.addf %10, %17 : vector<2x8x128xf32>
    %19 = vector.extract_strided_slice %2 {offsets = [0, 0, 2], sizes = [2, 1, 128], strides = [1, 1, 1]} : vector<2x1x130xf32> to vector<2x1x128xf32>
    %20 = vector.extract_strided_slice %0 {offsets = [2, 0, 0, 0], sizes = [1, 1, 8, 1], strides = [1, 1, 1, 1]} : vector<3x4x8x1xf32> to vector<1x1x8x1xf32>
    %21 = vector.shape_cast %20 : vector<1x1x8x1xf32> to vector<8x1xf32>
    %22 = vector.shape_cast %21 : vector<8x1xf32> to vector<1x8x1xf32>
    %23 = vector.broadcast %19 : vector<2x1x128xf32> to vector<2x8x128xf32>
    %24 = vector.broadcast %22 : vector<1x8x1xf32> to vector<2x8x128xf32>
    %25 = arith.mulf %23, %24 : vector<2x8x128xf32>
    %26 = arith.addf %18, %25 : vector<2x8x128xf32>
    %c0_6 = arith.constant 0 : index
    %c1 = arith.constant 1 : index
    %c0_7 = arith.constant 0 : index
    %27 = vector.load %arg1[%c0_6, %c1, %c0_7] : memref<2x4x130xf32, #tpu.memory_space<vmem>>, vector<2x1x130xf32>
    %28 = vector.extract_strided_slice %27 {offsets = [0, 0, 0], sizes = [2, 1, 128], strides = [1, 1, 1]} : vector<2x1x130xf32> to vector<2x1x128xf32>
    %29 = vector.extract_strided_slice %0 {offsets = [0, 1, 0, 0], sizes = [1, 1, 8, 1], strides = [1, 1, 1, 1]} : vector<3x4x8x1xf32> to vector<1x1x8x1xf32>
    %30 = vector.shape_cast %29 : vector<1x1x8x1xf32> to vector<8x1xf32>
    %31 = vector.shape_cast %30 : vector<8x1xf32> to vector<1x8x1xf32>
    %32 = vector.broadcast %28 : vector<2x1x128xf32> to vector<2x8x128xf32>
    %33 = vector.broadcast %31 : vector<1x8x1xf32> to vector<2x8x128xf32>
    %34 = arith.mulf %32, %33 : vector<2x8x128xf32>
    %35 = arith.addf %26, %34 : vector<2x8x128xf32>
    %36 = vector.extract_strided_slice %27 {offsets = [0, 0, 1], sizes = [2, 1, 128], strides = [1, 1, 1]} : vector<2x1x130xf32> to vector<2x1x128xf32>
    %37 = vector.extract_strided_slice %0 {offsets = [1, 1, 0, 0], sizes = [1, 1, 8, 1], strides = [1, 1, 1, 1]} : vector<3x4x8x1xf32> to vector<1x1x8x1xf32>
    %38 = vector.shape_cast %37 : vector<1x1x8x1xf32> to vector<8x1xf32>
    %39 = vector.shape_cast %38 : vector<8x1xf32> to vector<1x8x1xf32>
    %40 = vector.broadcast %36 : vector<2x1x128xf32> to vector<2x8x128xf32>
    %41 = vector.broadcast %39 : vector<1x8x1xf32> to vector<2x8x128xf32>
    %42 = arith.mulf %40, %41 : vector<2x8x128xf32>
    %43 = arith.addf %35, %42 : vector<2x8x128xf32>
    %44 = vector.extract_strided_slice %27 {offsets = [0, 0, 2], sizes = [2, 1, 128], strides = [1, 1, 1]} : vector<2x1x130xf32> to vector<2x1x128xf32>
    %45 = vector.extract_strided_slice %0 {offsets = [2, 1, 0, 0], sizes = [1, 1, 8, 1], strides = [1, 1, 1, 1]} : vector<3x4x8x1xf32> to vector<1x1x8x1xf32>
    %46 = vector.shape_cast %45 : vector<1x1x8x1xf32> to vector<8x1xf32>
    %47 = vector.shape_cast %46 : vector<8x1xf32> to vector<1x8x1xf32>
    %48 = vector.broadcast %44 : vector<2x1x128xf32> to vector<2x8x128xf32>
    %49 = vector.broadcast %47 : vector<1x8x1xf32> to vector<2x8x128xf32>
    %50 = arith.mulf %48, %49 : vector<2x8x128xf32>
    %51 = arith.addf %43, %50 : vector<2x8x128xf32>
    %c0_8 = arith.constant 0 : index
    %c2 = arith.constant 2 : index
    %c0_9 = arith.constant 0 : index
    %52 = vector.load %arg1[%c0_8, %c2, %c0_9] : memref<2x4x130xf32, #tpu.memory_space<vmem>>, vector<2x1x130xf32>
    %53 = vector.extract_strided_slice %52 {offsets = [0, 0, 0], sizes = [2, 1, 128], strides = [1, 1, 1]} : vector<2x1x130xf32> to vector<2x1x128xf32>
    %54 = vector.extract_strided_slice %0 {offsets = [0, 2, 0, 0], sizes = [1, 1, 8, 1], strides = [1, 1, 1, 1]} : vector<3x4x8x1xf32> to vector<1x1x8x1xf32>
    %55 = vector.shape_cast %54 : vector<1x1x8x1xf32> to vector<8x1xf32>
    %56 = vector.shape_cast %55 : vector<8x1xf32> to vector<1x8x1xf32>
    %57 = vector.broadcast %53 : vector<2x1x128xf32> to vector<2x8x128xf32>
    %58 = vector.broadcast %56 : vector<1x8x1xf32> to vector<2x8x128xf32>
    %59 = arith.mulf %57, %58 : vector<2x8x128xf32>
    %60 = arith.addf %51, %59 : vector<2x8x128xf32>
    %61 = vector.extract_strided_slice %52 {offsets = [0, 0, 1], sizes = [2, 1, 128], strides = [1, 1, 1]} : vector<2x1x130xf32> to vector<2x1x128xf32>
    %62 = vector.extract_strided_slice %0 {offsets = [1, 2, 0, 0], sizes = [1, 1, 8, 1], strides = [1, 1, 1, 1]} : vector<3x4x8x1xf32> to vector<1x1x8x1xf32>
    %63 = vector.shape_cast %62 : vector<1x1x8x1xf32> to vector<8x1xf32>
    %64 = vector.shape_cast %63 : vector<8x1xf32> to vector<1x8x1xf32>
    %65 = vector.broadcast %61 : vector<2x1x128xf32> to vector<2x8x128xf32>
    %66 = vector.broadcast %64 : vector<1x8x1xf32> to vector<2x8x128xf32>
    %67 = arith.mulf %65, %66 : vector<2x8x128xf32>
    %68 = arith.addf %60, %67 : vector<2x8x128xf32>
    %69 = vector.extract_strided_slice %52 {offsets = [0, 0, 2], sizes = [2, 1, 128], strides = [1, 1, 1]} : vector<2x1x130xf32> to vector<2x1x128xf32>
    %70 = vector.extract_strided_slice %0 {offsets = [2, 2, 0, 0], sizes = [1, 1, 8, 1], strides = [1, 1, 1, 1]} : vector<3x4x8x1xf32> to vector<1x1x8x1xf32>
    %71 = vector.shape_cast %70 : vector<1x1x8x1xf32> to vector<8x1xf32>
    %72 = vector.shape_cast %71 : vector<8x1xf32> to vector<1x8x1xf32>
    %73 = vector.broadcast %69 : vector<2x1x128xf32> to vector<2x8x128xf32>
    %74 = vector.broadcast %72 : vector<1x8x1xf32> to vector<2x8x128xf32>
    %75 = arith.mulf %73, %74 : vector<2x8x128xf32>
    %76 = arith.addf %68, %75 : vector<2x8x128xf32>
    %c0_10 = arith.constant 0 : index
    %c3 = arith.constant 3 : index
    %c0_11 = arith.constant 0 : index
    %77 = vector.load %arg1[%c0_10, %c3, %c0_11] : memref<2x4x130xf32, #tpu.memory_space<vmem>>, vector<2x1x130xf32>
    %78 = vector.extract_strided_slice %77 {offsets = [0, 0, 0], sizes = [2, 1, 128], strides = [1, 1, 1]} : vector<2x1x130xf32> to vector<2x1x128xf32>
    %79 = vector.extract_strided_slice %0 {offsets = [0, 3, 0, 0], sizes = [1, 1, 8, 1], strides = [1, 1, 1, 1]} : vector<3x4x8x1xf32> to vector<1x1x8x1xf32>
    %80 = vector.shape_cast %79 : vector<1x1x8x1xf32> to vector<8x1xf32>
    %81 = vector.shape_cast %80 : vector<8x1xf32> to vector<1x8x1xf32>
    %82 = vector.broadcast %78 : vector<2x1x128xf32> to vector<2x8x128xf32>
    %83 = vector.broadcast %81 : vector<1x8x1xf32> to vector<2x8x128xf32>
    %84 = arith.mulf %82, %83 : vector<2x8x128xf32>
    %85 = arith.addf %76, %84 : vector<2x8x128xf32>
    %86 = vector.extract_strided_slice %77 {offsets = [0, 0, 1], sizes = [2, 1, 128], strides = [1, 1, 1]} : vector<2x1x130xf32> to vector<2x1x128xf32>
    %87 = vector.extract_strided_slice %0 {offsets = [1, 3, 0, 0], sizes = [1, 1, 8, 1], strides = [1, 1, 1, 1]} : vector<3x4x8x1xf32> to vector<1x1x8x1xf32>
    %88 = vector.shape_cast %87 : vector<1x1x8x1xf32> to vector<8x1xf32>
    %89 = vector.shape_cast %88 : vector<8x1xf32> to vector<1x8x1xf32>
    %90 = vector.broadcast %86 : vector<2x1x128xf32> to vector<2x8x128xf32>
    %91 = vector.broadcast %89 : vector<1x8x1xf32> to vector<2x8x128xf32>
    %92 = arith.mulf %90, %91 : vector<2x8x128xf32>
    %93 = arith.addf %85, %92 : vector<2x8x128xf32>
    %94 = vector.extract_strided_slice %77 {offsets = [0, 0, 2], sizes = [2, 1, 128], strides = [1, 1, 1]} : vector<2x1x130xf32> to vector<2x1x128xf32>
    %95 = vector.extract_strided_slice %0 {offsets = [2, 3, 0, 0], sizes = [1, 1, 8, 1], strides = [1, 1, 1, 1]} : vector<3x4x8x1xf32> to vector<1x1x8x1xf32>
    %96 = vector.shape_cast %95 : vector<1x1x8x1xf32> to vector<8x1xf32>
    %97 = vector.shape_cast %96 : vector<8x1xf32> to vector<1x8x1xf32>
    %98 = vector.broadcast %94 : vector<2x1x128xf32> to vector<2x8x128xf32>
    %99 = vector.broadcast %97 : vector<1x8x1xf32> to vector<2x8x128xf32>
    %100 = arith.mulf %98, %99 : vector<2x8x128xf32>
    %101 = arith.addf %93, %100 : vector<2x8x128xf32>
    %102 = tpu.iota {dimensions = array<i32: 2>} : vector<1x1x128xi32>
    %c14_i32 = arith.constant 14 : i32
    %103 = vector.broadcast %c14_i32 : i32 to vector<1x1x128xi32>
    %104 = arith.cmpi slt, %102, %103 : vector<1x1x128xi32>
    %cst_12 = arith.constant 0.000000e+00 : f32
    %105 = vector.shape_cast %104 : vector<1x1x128xi1> to vector<1x1x128xi1>
    %106 = vector.broadcast %105 : vector<1x1x128xi1> to vector<2x8x128xi1>
    %107 = vector.broadcast %cst_12 : f32 to vector<2x8x128xf32>
    %108 = arith.select %106, %101, %107 : vector<2x8x128xi1>, vector<2x8x128xf32>
    %cst_13 = arith.constant dense<0.000000e+00> : vector<8xf32>
    %109 = vector.multi_reduction <add>, %108, %cst_13 [0, 2] : vector<2x8x128xf32> to vector<8xf32>
    %110 = vector.shape_cast %109 : vector<8xf32> to vector<1x8x1xf32>
    %cst_14 = arith.constant 2.800000e+01 : f32
    %111 = vector.broadcast %cst_14 : f32 to vector<1x8x1xf32>
    %112 = arith.divf %110, %111 : vector<1x8x1xf32>
    %113 = vector.broadcast %112 : vector<1x8x1xf32> to vector<2x8x128xf32>
    %114 = arith.subf %101, %113 : vector<2x8x128xf32>
    %cst_15 = arith.constant 0.000000e+00 : f32
    %115 = vector.shape_cast %104 : vector<1x1x128xi1> to vector<1x1x128xi1>
    %116 = vector.broadcast %115 : vector<1x1x128xi1> to vector<2x8x128xi1>
    %117 = vector.broadcast %cst_15 : f32 to vector<2x8x128xf32>
    %118 = arith.select %116, %114, %117 : vector<2x8x128xi1>, vector<2x8x128xf32>
    %119 = arith.mulf %118, %118 : vector<2x8x128xf32>
    %cst_16 = arith.constant dense<0.000000e+00> : vector<8xf32>
    %120 = vector.multi_reduction <add>, %119, %cst_16 [0, 2] : vector<2x8x128xf32> to vector<8xf32>
    %121 = vector.shape_cast %120 : vector<8xf32> to vector<1x8x1xf32>
    %cst_17 = arith.constant 2.800000e+01 : f32
    %122 = vector.broadcast %cst_17 : f32 to vector<1x8x1xf32>
    %123 = arith.divf %121, %122 : vector<1x8x1xf32>
    %cst_18 = arith.constant 1.000000e-03 : f32
    %124 = vector.broadcast %cst_18 : f32 to vector<1x8x1xf32>
    %125 = arith.addf %123, %124 : vector<1x8x1xf32>
    %126 = math.rsqrt %125 : vector<1x8x1xf32>
    %c0_19 = arith.constant 0 : index
    %c0_20 = arith.constant 0 : index
    %127 = vector.load %arg3[%c0_19, %c0_20] : memref<8x1xf32, #tpu.memory_space<vmem>>, vector<8x1xf32>
    %128 = vector.shape_cast %127 : vector<8x1xf32> to vector<1x8x1xf32>
    %c0_21 = arith.constant 0 : index
    %c0_22 = arith.constant 0 : index
    %129 = vector.load %arg4[%c0_21, %c0_22] : memref<8x1xf32, #tpu.memory_space<vmem>>, vector<8x1xf32>
    %130 = vector.shape_cast %129 : vector<8x1xf32> to vector<1x8x1xf32>
    %131 = arith.mulf %128, %126 : vector<1x8x1xf32>
    %132 = arith.mulf %112, %131 : vector<1x8x1xf32>
    %133 = arith.subf %130, %132 : vector<1x8x1xf32>
    %134 = vector.broadcast %131 : vector<1x8x1xf32> to vector<2x8x128xf32>
    %135 = arith.mulf %101, %134 : vector<2x8x128xf32>
    %136 = vector.broadcast %133 : vector<1x8x1xf32> to vector<2x8x128xf32>
    %137 = arith.addf %135, %136 : vector<2x8x128xf32>
    %cst_23 = arith.constant 0.000000e+00 : f32
    %138 = vector.broadcast %cst_23 : f32 to vector<2x8x128xf32>
    %139 = arith.maximumf %137, %138 : vector<2x8x128xf32>
    %c0_24 = arith.constant 0 : index
    %c0_25 = arith.constant 0 : index
    %c0_26 = arith.constant 0 : index
    %140 = vector.load %arg5[%c0_24, %c0_25, %c0_26] : memref<2x8x128xf32, #tpu.memory_space<vmem>>, vector<2x8x128xf32>
    tpu.vector_store %arg5[%c0_24, %c0_25, %c0_26], %139 {strides = array<i32>} : memref<2x8x128xf32, #tpu.memory_space<vmem>>, vector<2x8x128xf32>,
    return
  }
  func.func @transform_0(%arg0: i32) -> (i32, i32, i32) {
    %c0_i32 = arith.constant 0 : i32
    %c0_i32_0 = arith.constant 0 : i32
    %c0_i32_1 = arith.constant 0 : i32
    %c0_i32_2 = arith.constant 0 : i32
    return %c0_i32, %c0_i32_0, %c0_i32_1 : i32, i32, i32
  }
  func.func @transform_1(%arg0: i32) -> (i32, i32, i32, i32) {
    %c0_i32 = arith.constant 0 : i32
    %c0_i32_0 = arith.constant 0 : i32
    %c0_i32_1 = arith.constant 0 : i32
    %c0_i32_2 = arith.constant 0 : i32
    return %c0_i32, %c0_i32_0, %arg0, %c0_i32_1 : i32, i32, i32, i32
  }
  func.func @transform_2(%arg0: i32) -> (i32, i32) {
    %c0_i32 = arith.constant 0 : i32
    %c0_i32_0 = arith.constant 0 : i32
    return %arg0, %c0_i32 : i32, i32
  }
  func.func @transform_3(%arg0: i32) -> (i32, i32) {
    %c0_i32 = arith.constant 0 : i32
    %c0_i32_0 = arith.constant 0 : i32
    return %arg0, %c0_i32 : i32, i32
  }
  func.func @transform_4(%arg0: i32) -> (i32, i32, i32) {
    %c0_i32 = arith.constant 0 : i32
    %c0_i32_0 = arith.constant 0 : i32
    %c0_i32_1 = arith.constant 0 : i32
    return %c0_i32, %arg0, %c0_i32_0 : i32, i32, i32
  }
}

</mosaic_0001>

<bundles_post_ra>
// kernel: tpu_custom_call.1
= control target key start
LH: loop header
LB: loop body
LE: loop exit
PB: predicated region body
PF: predicated region fallthrough
CT: control target
= control target key end

     0   :  { %v466_v2 = vmov 0   ;;  %s667_s0 = inlined_call_operand.vmem [shape: f32[2,4,130], index: 0, kind: input, shape index: {}]   ;;  %s668_s1 = inlined_call_operand.vmem [shape: f32[3,4,8,1], index: 1, kind: input, shape index: {}]   ;;  %s669_s2 = inlined_call_operand.vmem [shape: f32[8,1], index: 2, kind: input, shape index: {}]   ;;  %s670_s3 = inlined_call_operand.vmem [shape: f32[8,1], index: 3, kind: input, shape index: {}]   ;;  %s671_s4 = inlined_call_operand.hbm [shape: f32[2,8,128], index: 4, kind: output, shape index: {}]  }
   0x1   :  { %v22_v0 = vld [vmem:[%s668_s1 + $0x20] sm:$0xff]  ;;  %v23_v1 = vld [vmem:[%s668_s1 + $0x28] sm:$0xff]  ;;  %433 = vset.pattern.permute.xlu0 %v466_v2  ;;  %434 = vset.pattern.permute.xlu1 %v466_v2  ;;  %v24_v3 = vld [vmem:[%s668_s1 + $0x30] sm:$0xff] }
   0x2   :  { %54 = vperm.xlu0 %433, %v22_v0   ;;  %133 = vperm.xlu1 %434, %v23_v1  }
   0x3   :  { %435 = vset.pattern.permute.xlu2 %v466_v2 }
   0x4   :  { %9 = vsyncpa [#allocation3], 0  ;;  %210 = vperm.xlu2 %435, %v24_v3   ;;  %v26_v4 = vld [vmem:[%s668_s1 + $0x40] sm:$0xff]  ;;  %v27_v5 = vld [vmem:[%s668_s1 + $0x48] sm:$0xff]  ;;  %s468_s19 = smov 126   ;;  %vm73_vm0 = vcmask 1039360  }
   0x5   :  { %v28_v6 = vld [vmem:[%s668_s1 + $0x50] sm:$0xff]  ;;  %v25_v7 = vld [vmem:[%s668_s1 + $0x38] sm:$0xff]  ;;  %v18_v9 = vld [vmem:[%s668_s1] sm:$0xff]  ;;  %vm101_vm1 = vcmask 1031168   ;;  %s470_s7 = smov [#allocation2]   ;;  %s472_s11 = smov 8  }
   0x6   :  { %v29_v8 = vld [vmem:[%s668_s1 + $0x58] sm:$0xff]  ;;  %v19_v10 = vld [vmem:[%s668_s1 + $0x8] sm:$0xff]  ;;  %v20_v11 = vld [vmem:[%s668_s1 + $0x10] sm:$0xff]  ;;  %s405_s8 = sshll.u32 %s470_s7, 4  ;;  %s406_s8 = int_to_ptr.vmem [resolvable:$true] %s405_s8 }
   0x7   :  { %v21_v12 = vld [vmem:[%s668_s1 + $0x18] sm:$0xff]  ;;  %v30_v15 = vld [vmem:[%s667_s0] ss:$4 sm:$0x3]  ;;  %s467_s1 = smov 127  }
   0x8   :  { %v419_v16 = vld [vmem:[%s667_s0 + $0x8] ss:$4 sm:$0x3]  ;;  %v35_v17 = vperm.slane %v30_v15, 0  ;;  %v48_v22 = vperm.slane %v30_v15, 1 }
   0x9   :  { %v36_v18 = vperm.slane %v419_v16, 0  ;;  %v49_v27 = vperm.slane %v419_v16, 1  ;;  %v421_v32 = vld [vmem:[%s667_s0 + $0x9] ss:$4 sm:$0x3] }
   0xa   :  { %82 = vperm.xlu0 %433, %v26_v4   ;;  %160 = vperm.xlu1 %434, %v27_v5   ;;  %v557_v33 = vperm.slane %v421_v32, 0  ;;  %v420_v36 = vld [vmem:[%s667_s0 + $0x1] ss:$4 sm:$0x3]  ;;  %v128_v47 = vperm.slane %v421_v32, 1 }
   0xb   :  { %v565_v39 = vperm.slane %v420_v36, 0  ;;  %v127_v40 = vperm.slane %v420_v36, 1  ;;  %v423_v45 = vld [vmem:[%s667_s0 + $0xa] ss:$4 sm:$0x3] }
   0xc   :  { %237 = vperm.xlu2 %435, %v28_v6   ;;  %v575_v46 = vperm.slane %v423_v45, 0  ;;  %v422_v51 = vld [vmem:[%s667_s0 + $0x2] ss:$4 sm:$0x3]  ;;  %v205_v0 = vperm.slane %v423_v45, 1 }
   0xd   :  { %v204_v52 = vperm.slane %v422_v51, 1  ;;  %v588_v56 = vperm.slane %v422_v51, 0  ;;  %v425_v57 = vld [vmem:[%s667_s0 + $0xb] ss:$4 sm:$0x3] }
   0xe   :  { %v596_v58 = vperm.slane %v425_v57, 0  ;;  %v424_v63 = vld [vmem:[%s667_s0 + $0x3] ss:$4 sm:$0x3] }
   0xf   :  { %v281_v2 = vperm.slane %v424_v63, 1 }
  0x12   :  { %287 = vperm.xlu0 %433, %v25_v7   ;;  %314 = vperm.xlu1 %434, %v29_v8   ;;  %v619_v8 = vperm.slane %v424_v63, 0 }
  0x14   :  { %41 = vperm.xlu2 %435, %v18_v9  }
  0x1c   :  { %120 = vperm.xlu2 %435, %v19_v10  }
  0x24   :  { %197 = vperm.xlu2 %435, %v20_v11   ;;  %v282_v11 = vperm.slane %v425_v57, 1 }
  0x2c   :  { %274 = vperm.xlu2 %435, %v21_v12  }
  0x5e   :  { %v534_v13 = vpop.permute.xlu2 %210 }
  0x5f   :  { %v215_v48 = vmul.f32 %v534_v13, %v575_v46  ;;  %v213_v60 = vmul.f32 %v534_v13, %v588_v56  ;;  %v214_v61 = vmul.f32 %v534_v13, %v204_v52  ;;  %v216_v3 = vmul.f32 %v534_v13, %v205_v0 }
  0x66   :  { %v536_v14 = vpop.permute.xlu2 %237 }
  0x67   :  { %v241_v53 = vmul.f32 %v536_v14, %v204_v52  ;;  %v240_v4 = vmul.f32 %v536_v14, %v588_v56  ;;  %v242_v6 = vmul.f32 %v536_v14, %v575_v46  ;;  %v243_v7 = vmul.f32 %v536_v14, %v205_v0 }
  0x6e   :  { %v42_v19 = vpop.permute.xlu2 %41 }
  0x6f   :  { %v544_v20 = vmul.f32 %v42_v19, %v35_v17  ;;  %v546_v21 = vmul.f32 %v42_v19, %v36_v18 }
  0x74   :  { %v55_v23 = vpop.permute.xlu0 %54  ;;  %v134_v34 = vpop.permute.xlu1 %133 }
  0x75   :  { %v58_v24 = vmul.f32 %v55_v23, %v48_v22  ;;  %v57_v25 = vmul.f32 %v55_v23, %v35_v17  ;;  %v59_v26 = vmul.f32 %v55_v23, %v36_v18  ;;  %v60_v29 = vmul.f32 %v55_v23, %v49_v27 }
  0x76   :  { %v138_v35 = vmul.f32 %v134_v34, %v557_v33  ;;  %v136_v42 = vmul.f32 %v134_v34, %v565_v39  ;;  %v137_v43 = vmul.f32 %v134_v34, %v127_v40  ;;  %v139_v49 = vmul.f32 %v134_v34, %v128_v47  ;;  %v121_v14 = vpop.permute.xlu2 %120 }
  0x77   :  { %67 = vrot.lane.b32.xlu1 %v58_v24, %s467_s1  ;;  %65 = vrot.lane.b32.xlu0 %v57_v25, %s467_s1 }
  0x78   :  { %69 = vrot.lane.b32.xlu2 %v59_v26, %s467_s1 }
  0x7c   :  { %v83_v28 = vpop.permute.xlu0 %82  ;;  %v161_v41 = vpop.permute.xlu1 %160 }
  0x7d   :  { %v85_v30 = vmul.f32 %v83_v28, %v35_v17  ;;  %v86_v31 = vmul.f32 %v83_v28, %v48_v22  ;;  %v87_v37 = vmul.f32 %v83_v28, %v36_v18  ;;  %v88_v38 = vmul.f32 %v83_v28, %v49_v27 }
  0x7e   :  { %v164_v44 = vmul.f32 %v161_v41, %v127_v40  ;;  %v163_v50 = vmul.f32 %v161_v41, %v565_v39  ;;  %v165_v54 = vmul.f32 %v161_v41, %v557_v33  ;;  %v166_v55 = vmul.f32 %v161_v41, %v128_v47  ;;  %v198_v17 = vpop.permute.xlu2 %197 }
  0x7f   :  { %71 = vrot.lane.b32.xlu0 %v60_v29, %s467_s1  ;;  %93 = vrot.lane.b32.xlu1 %v85_v30, %s468_s19  ;;  %v123_v30 = vmul.f32 %v121_v14, %v565_v39 }
  0x80   :  { %95 = vrot.lane.b32.xlu2 %v86_v31, %s468_s19 }
  0x84   :  { %v288_v59 = vpop.permute.xlu0 %287  ;;  %v315_v1 = vpop.permute.xlu1 %314 }
  0x85   :  { %v292_v62 = vmul.f32 %v288_v59, %v596_v58  ;;  %v318_v5 = vmul.f32 %v315_v1, %v281_v2  ;;  %v291_v9 = vmul.f32 %v288_v59, %v281_v2  ;;  %v290_v10 = vmul.f32 %v288_v59, %v619_v8 }
  0x86   :  { %v317_v12 = vmul.f32 %v315_v1, %v619_v8  ;;  %v293_v13 = vmul.f32 %v288_v59, %v282_v11  ;;  %v320_v15 = vmul.f32 %v315_v1, %v282_v11  ;;  %v319_v16 = vmul.f32 %v315_v1, %v596_v58  ;;  %v275_v18 = vpop.permute.xlu2 %274 }
  0x87   :  { %97 = vrot.lane.b32.xlu0 %v87_v37, %s468_s19  ;;  %99 = vrot.lane.b32.xlu1 %v88_v38, %s468_s19  ;;  %v201_v59 = vmul.f32 %v198_v17, %v575_v46 }
  0x88   :  { %148 = vrot.lane.b32.xlu2 %v138_v35, %s467_s1 }
  0x8f   :  { %144 = vrot.lane.b32.xlu0 %v136_v42, %s467_s1  ;;  %146 = vrot.lane.b32.xlu1 %v137_v43, %s467_s1 }
  0x90   :  { %173 = vrot.lane.b32.xlu2 %v164_v44, %s468_s19 }
  0x97   :  { %150 = vrot.lane.b32.xlu0 %v139_v49, %s467_s1  ;;  %171 = vrot.lane.b32.xlu1 %v163_v50, %s468_s19 }
  0x98   :  { %225 = vrot.lane.b32.xlu2 %v215_v48, %s467_s1 }
  0x9f   :  { %175 = vrot.lane.b32.xlu0 %v165_v54, %s468_s19  ;;  %177 = vrot.lane.b32.xlu1 %v166_v55, %s468_s19 }
  0xa0   :  { %250 = vrot.lane.b32.xlu2 %v241_v53, %s468_s19 }
  0xa7   :  { %221 = vrot.lane.b32.xlu0 %v213_v60, %s467_s1  ;;  %223 = vrot.lane.b32.xlu1 %v214_v61, %s467_s1 }
  0xa8   :  { %302 = vrot.lane.b32.xlu2 %v292_v62, %s467_s1 }
  0xaf   :  { %227 = vrot.lane.b32.xlu0 %v216_v3, %s467_s1  ;;  %248 = vrot.lane.b32.xlu1 %v240_v4, %s468_s19 }
  0xb0   :  { %327 = vrot.lane.b32.xlu2 %v318_v5, %s468_s19 }
  0xb7   :  { %252 = vrot.lane.b32.xlu0 %v242_v6, %s468_s19  ;;  %254 = vrot.lane.b32.xlu1 %v243_v7, %s468_s19  ;;  %v277_v6 = vmul.f32 %v275_v18, %v619_v8 }
  0xbf   :  { %300 = vrot.lane.b32.xlu1 %v291_v9, %s467_s1  ;;  %298 = vrot.lane.b32.xlu0 %v290_v10, %s467_s1 }
  0xc7   :  { %325 = vrot.lane.b32.xlu1 %v317_v12, %s468_s19  ;;  %304 = vrot.lane.b32.xlu0 %v293_v13, %s467_s1 }
  0xcf   :  { %331 = vrot.lane.b32.xlu1 %v320_v15, %s468_s19  ;;  %329 = vrot.lane.b32.xlu0 %v319_v16, %s468_s19 }
  0xd2   :  { %v70_v19 = vpop.permute.xlu2 %69 }
  0xda   :  { %v96_v26 = vpop.permute.xlu2 %95 }
  0xe2   :  { %v149_v42 = vpop.permute.xlu2 %148 }
  0xe9   :  { %v68_v22 = vpop.permute.xlu1 %67  ;;  %v66_v23 = vpop.permute.xlu0 %65 }
  0xea   :  { %v74_v24 = vsel %vm73_vm0, %v66_v23, %v68_v22  ;;  %v174_v39 = vpop.permute.xlu2 %173 }
  0xeb   :  { %v78_v25 = vadd.f32 %v74_v24, %v544_v20  ;;  %v124_v20 = vmul.f32 %v121_v14, %v557_v33  ;;  %v278_v14 = vmul.f32 %v275_v18, %v596_v58 }
  0xf1   :  { %v94_v27 = vpop.permute.xlu1 %93  ;;  %v72_v28 = vpop.permute.xlu0 %71 }
  0xf2   :  { %v102_v29 = vsel %vm101_vm1, %v94_v27, %v96_v26  ;;  %v75_v34 = vsel %vm73_vm0, %v70_v19, %v72_v28  ;;  %v226_v62 = vpop.permute.xlu2 %225 }
  0xf3   :  { %v106_v31 = vadd.f32 %v102_v29, %v78_v25  ;;  %v79_v35 = vadd.f32 %v75_v34, %v546_v21  ;;  %v200_v21 = vmul.f32 %v198_v17, %v588_v56  ;;  %v339_v25 = vlaneseq }
  0xf5   :  { %v125_v32 = vadd.f32 %v123_v30, %v106_v31  ;;  %v340_v29 = vand.u32 127, %v339_v25 }
  0xf7   :  { %vm341_vm2 = vcmp.lt.s32.totalorder %v340_v29, 14 }
  0xf9   :  { %v100_v36 = vpop.permute.xlu1 %99  ;;  %v98_v37 = vpop.permute.xlu0 %97 }
  0xfa   :  { %v103_v38 = vsel %vm101_vm1, %v98_v37, %v100_v36  ;;  %v251_v2 = vpop.permute.xlu2 %250 }
  0xfb   :  { %v107_v40 = vadd.f32 %v103_v38, %v79_v35 }
  0xfd   :  { %v126_v41 = vadd.f32 %v124_v20, %v107_v40  ;;  %v469_v20 = vmov 28.0  }
  0xfe   :  { %436 = vrcp.f32 %v469_v20 }
 0x101   :  { %v147_v43 = vpop.permute.xlu1 %146  ;;  %v145_v44 = vpop.permute.xlu0 %144 }
 0x102   :  { %v152_v45 = vsel %vm73_vm0, %v145_v44, %v147_v43  ;;  %v303_v22 = vpop.permute.xlu2 %302 }
 0x103   :  { %v156_v47 = vadd.f32 %v152_v45, %v125_v32 }
 0x104   :  { %v437_v40 = vpop.eup %436 }
 0x105   :  { %vm354_vm3 = vweird.f32 %v437_v40 }
 0x109   :  { %v172_v48 = vpop.permute.xlu1 %171  ;;  %v151_v49 = vpop.permute.xlu0 %150 }
 0x10a   :  { %v179_v50 = vsel %vm101_vm1, %v172_v48, %v174_v39  ;;  %v153_v53 = vsel %vm73_vm0, %v149_v42, %v151_v49  ;;  %v328_v26 = vpop.permute.xlu2 %327 }
 0x10b   :  { %v183_v51 = vadd.f32 %v179_v50, %v156_v47  ;;  %v157_v33 = vadd.f32 %v153_v53, %v126_v41  ;;  %v350_v41 = vmul.f32 28.0, %v437_v40 }
 0x10d   :  { %v202_v52 = vadd.f32 %v200_v21, %v183_v51  ;;  %v351_v42 = vsub.f32 1.0, %v350_v41 }
 0x10f   :  { %v352_v43 = vmul.f32 %v437_v40, %v351_v42 }
 0x111   :  { %v178_v54 = vpop.permute.xlu1 %177  ;;  %v176_v55 = vpop.permute.xlu0 %175  ;;  %v353_v44 = vadd.f32 %v437_v40, %v352_v43 }
 0x112   :  { %v180_v57 = vsel %vm101_vm1, %v176_v55, %v178_v54 }
 0x113   :  { %v184_v60 = vadd.f32 %v180_v57, %v157_v33  ;;  %v355_v45 = vsel %vm354_vm3, %v437_v40, %v353_v44 }
 0x115   :  { %v203_v61 = vadd.f32 %v201_v59, %v184_v60 }
 0x119   :  { %v224_v63 = vpop.permute.xlu1 %223  ;;  %v222_v0 = vpop.permute.xlu0 %221 }
 0x11a   :  { %v229_v1 = vsel %vm73_vm0, %v222_v0, %v224_v63  ;;  %v378_v0 = vld [vmem:[%s669_s2] sm:$0xff]  ;;  %s407_s2 = sshll.u32 %s671_s4, 4  ;;  %s408_s2 = int_to_ptr.hbm [resolvable:$true] %s407_s2 }
 0x11b   :  { %v233_v56 = vadd.f32 %v229_v1, %v202_v52 }
 0x121   :  { %v249_v3 = vpop.permute.xlu1 %248  ;;  %v228_v4 = vpop.permute.xlu0 %227 }
 0x122   :  { %v256_v5 = vsel %vm101_vm1, %v249_v3, %v251_v2  ;;  %v230_v10 = vsel %vm73_vm0, %v226_v62, %v228_v4  ;;  %v379_v3 = vld [vmem:[%s670_s3] sm:$0xff]  ;;  %s471_s3 = smov 128  }
 0x123   :  { %v260_v7 = vadd.f32 %v256_v5, %v233_v56  ;;  %v234_v46 = vadd.f32 %v230_v10, %v203_v61 }
 0x125   :  { %v279_v9 = vadd.f32 %v277_v6, %v260_v7 }
 0x129   :  { %v255_v11 = vpop.permute.xlu1 %254  ;;  %v253_v12 = vpop.permute.xlu0 %252 }
 0x12a   :  { %v257_v13 = vsel %vm101_vm1, %v253_v12, %v255_v11 }
 0x12b   :  { %v261_v15 = vadd.f32 %v257_v13, %v234_v46 }
 0x12d   :  { %v280_v16 = vadd.f32 %v278_v14, %v261_v15 }
 0x131   :  { %v301_v17 = vpop.permute.xlu1 %300  ;;  %v299_v19 = vpop.permute.xlu0 %298 }
 0x132   :  { %v306_v8 = vsel %vm73_vm0, %v299_v19, %v301_v17 }
 0x133   :  { %v310_v30 = vadd.f32 %v306_v8, %v279_v9 }
 0x139   :  { %v326_v23 = vpop.permute.xlu1 %325  ;;  %v305_v24 = vpop.permute.xlu0 %304 }
 0x13a   :  { %v333_v27 = vsel %vm101_vm1, %v326_v23, %v328_v26  ;;  %v307_v28 = vsel %vm73_vm0, %v303_v22, %v305_v24 }
 0x13b   :  { %v337_v31 = vadd.f32 %v333_v27, %v310_v30  ;;  %v311_v32 = vadd.f32 %v307_v28, %v280_v16 }
 0x13d   :  { %v344_v36 = vsel %vm341_vm2, %v337_v31, 0.0 }
 0x141   :  { %v332_v58 = vpop.permute.xlu1 %331  ;;  %v330_v18 = vpop.permute.xlu0 %329 }
 0x142   :  { %v334_v34 = vsel %vm101_vm1, %v330_v18, %v332_v58 }
 0x143   :  { %v338_v35 = vadd.f32 %v334_v34, %v311_v32 }
 0x145   :  { %v345_v37 = vsel %vm341_vm2, %v338_v35, 0.0 }
 0x146   :  { %v346_v38 = vadd.f32 %v345_v37, %v344_v36 }
 0x148   :  { %347 = vadd.xlane.f32.xlu2 %v346_v38 }
 0x1bb   :  { %v348_v39 = vpop.xlane.xlu2 %347 }
 0x1bc   :  { %v356_v47 = vmul.f32 %v355_v45, %v348_v39 }
 0x1be   :  { %v357_v48 = vsub.f32 %v337_v31, %v356_v47  ;;  %v358_v49 = vsub.f32 %v338_v35, %v356_v47 }
 0x1c0   :  { %v359_v50 = vsel %vm341_vm2, %v357_v48, 0.0  ;;  %v360_v21 = vsel %vm341_vm2, %v358_v49, 0.0 }
 0x1c1   :  { %v361_v51 = vmul.f32 %v359_v50, %v359_v50  ;;  %v362_v52 = vmul.f32 %v360_v21, %v360_v21 }
 0x1c3   :  { %v363_v53 = vadd.f32 %v362_v52, %v361_v51 }
 0x1c5   :  { %364 = vadd.xlane.f32.xlu0 %v363_v53 }
 0x238   :  { %v365_v33 = vpop.xlane.xlu0 %364 }
 0x239   :  { %v366_v54 = vmul.f32 %v365_v33, %v355_v45 }
 0x23b   :  { %v367_v55 = vadd.f32 0.001, %v366_v54 }
 0x23d   :  { %438 = vrsqrt.f32 %v367_v55  ;;  %vm374_vm5 = vweird.f32 %v367_v55 }
 0x243   :  { %v439_v57 = vpop.eup %438 }
 0x244   :  { %v369_v59 = vmul.f32 %v439_v57, %v367_v55  ;;  %vm375_vm4 = vweird.f32 %v439_v57 }
 0x245   :  { %vm376_vm6 = vmor %vm374_vm5, %vm375_vm4 }
 0x246   :  { %v370_v60 = vmul.f32 %v439_v57, %v369_v59 }
 0x248   :  { %v371_v61 = vmul.f32 0.5, %v370_v60 }
 0x24a   :  { %v372_v62 = vsub.f32 1.5, %v371_v61 }
 0x24c   :  { %v373_v63 = vmul.f32 %v439_v57, %v372_v62 }
 0x24e   :  { %v377_v1 = vsel %vm376_vm6, %v439_v57, %v373_v63 }
 0x24f   :  { %v380_v2 = vmul.f32 %v378_v0, %v377_v1 }
 0x251   :  { %385 = vperm.xlu1 %434, %v380_v2   ;;  %v381_v56 = vmul.f32 %v380_v2, %v356_v47 }
 0x253   :  { %v382_v4 = vsub.f32 %v379_v3, %v381_v56 }
 0x259   :  { %392 = vperm.xlu1 %434, %v382_v4  }
 0x2c3   :  { %v386_v5 = vpop.permute.xlu1 %385 }
 0x2c4   :  { %v388_v6 = vmul.f32 %v386_v5, %v337_v31  ;;  %v389_v7 = vmul.f32 %v386_v5, %v338_v35 }
 0x2cb   :  { %v393_v9 = vpop.permute.xlu1 %392 }
 0x2cc   :  { %v395_v10 = vadd.f32 %v393_v9, %v388_v6  ;;  %v396_v46 = vadd.f32 %v393_v9, %v389_v7 }
 0x2ce   :  { %v397_v11 = vmax.f32 %v395_v10, 0.0  ;;  %v398_v12 = vmax.f32 %v396_v46, 0.0 }
 0x2d0   :  { %399 = vst [vmem:[#allocation2] sm:$0xff] %v397_v11 }
 0x2d1   :  { %400 = vst [vmem:[#allocation2 + $0x8] sm:$0xff] %v398_v12 }
 0x2d2   :  { %413 = dma.vmem_to_hbm [thread:$0]  %s406_s8, 256, %s408_s2, [#allocation3], %s471_s3, %s471_s3, %s472_s11  }
 0x2d3   :  { %464 = dma.done.wait [#allocation3], 256  }
 0x2d4   :  { %465 = vsyncadd [#allocation3], 4294967040 }
 0x2d5   :  { %418 = vsyncpa [#allocation3], 1 }

</bundles_post_ra>
